<compile_context>
chip_gen: v6e
topology: v6e:2x2x1
jax: 0.10.0
libtpu: 0.0.40
codegen_flags: <defaults>
</compile_context>

<pallas_src>
import jax
import jax.numpy as jnp
from jax.experimental import pallas as pl
from jax.experimental.pallas import tpu as pltpu


def _round_up(n, m):
    return ((n + m - 1) // m) * m


def _sublane_multiple(dtype):
    # Minimum sublane tile for the dtype: 8 (f32), 16 (bf16), 32 (int8/fp8).
    return max(8, 32 // jnp.dtype(dtype).itemsize)


def _pe_sum_kernel(pe_ref, o_ref):
    # pe_ref: (n_scales, ts, Dp) VMEM tile of the stacked tables.
    # o_ref:  (ts, Dp).  Pure VPU elementwise adds, fully lane-dense.
    acc = pe_ref[0]
    for s in range(1, pe_ref.shape[0]):
        acc = acc + pe_ref[s]
    o_ref[...] = acc


def prepare_pe_params(pe_tables):
    """One-time (parameter-init time) packing of the module's parameters.

    Stacks the per-scale (1, max_len, d_model) tables into a single
    (n_scales, Lp, Dp) array with the feature dim zero-padded to a multiple of
    128 and the position dim padded to the dtype's sublane multiple.  This is
    done once, so the per-forward kernel never pays for a relayout/reshape.

    Returns (pe_stacked, max_len, d_model).
    """
    n = len(pe_tables)
    _, max_len, d_model = pe_tables[0].shape
    dtype = pe_tables[0].dtype
    sub = _sublane_multiple(dtype)
    l_pad = _round_up(max_len, sub)
    d_pad = _round_up(d_model, 128)
    stacked = jnp.stack([pe.reshape(max_len, d_model) for pe in pe_tables], axis=0)
    if (l_pad, d_pad) != (max_len, d_model):
        stacked = jnp.pad(
            stacked, ((0, 0), (0, l_pad - max_len), (0, d_pad - d_model)))
    assert stacked.shape == (n, l_pad, d_pad)
    return stacked, max_len, d_model


def multi_scale_positional_embedding(x, pe_stacked, max_len, d_model, *,
                                     pipeline_vmem_budget_bytes=16 * 1024 * 1024):
    """x: (B, S, D) (only S is used, as in the PyTorch module).

    pe_stacked: (n_scales, Lp, Dp) from `prepare_pe_params`.
    Returns (1, S, d_model) == sum_i pe_i[:, :S, :].
    """
    n_scales, l_pad, d_pad = pe_stacked.shape
    seq_len = int(x.shape[1])
    assert seq_len <= max_len, "sequence longer than positional table"
    dtype = pe_stacked.dtype
    itemsize = jnp.dtype(dtype).itemsize

    sub = _sublane_multiple(dtype)
    rows_out = _round_up(seq_len, sub)          # kernel-visible output rows
    assert rows_out <= l_pad                    # guaranteed by init-time padding

    # --- Row-tile size -------------------------------------------------------
    # Pipeline footprint = 2 buffers x (n_scales input slabs + 1 output slab)
    # of (ts, Dp) each; keep it under the budget (default 16 MiB -> fits under
    # the explicit 32 MiB vmem limit on every generation, incl. v7x's 64 MiB
    # physical VMEM).
    bytes_per_row_set = (n_scales + 1) * d_pad * itemsize
    ts_cap = pipeline_vmem_budget_bytes // (2 * bytes_per_row_set)
    ts_cap = max(sub, (ts_cap // sub) * sub)
    ts = min(ts_cap, rows_out)

    # Megacore (v7x has 2 TensorCores): when there is enough data to stream,
    # force >= 4 row tiles so the "parallel" grid axis can be sharded across
    # both cores.  Cheap (~0.35us per extra step) on single-TC chips.
    out_bytes = rows_out * d_pad * itemsize
    if out_bytes >= 2 * 1024 * 1024 and rows_out >= 4 * sub:
        ts = min(ts, _round_up(pl.cdiv(rows_out, 4), sub))
    ts = max(ts, sub)

    grid = (pl.cdiv(rows_out, ts),)

    # One stacked input block per step: (n_scales, ts, Dp).  Last two dims are
    # (sublane, lane) aligned; leading dim is the full (tiny) scale axis.
    in_spec = pl.BlockSpec((n_scales, ts, d_pad), lambda i: (0, i, 0))
    out_spec = pl.BlockSpec((ts, d_pad), lambda i: (i, 0))

    out = pl.pallas_call(
        _pe_sum_kernel,
        out_shape=jax.ShapeDtypeStruct((rows_out, d_pad), dtype),
        grid_spec=pltpu.PrefetchScalarGridSpec(
            num_scalar_prefetch=0,
            grid=grid,
            in_specs=[in_spec],
            out_specs=out_spec,
        ),
        compiler_params=pltpu.CompilerParams(
            # Row tiles are independent -> shard across TensorCores on
            # megacore parts (v7x); harmless on single-TC chips.
            dimension_semantics=("parallel",),
            vmem_limit_bytes=32 * 1024 * 1024,
        ),
        cost_estimate=pl.CostEstimate(
            flops=(n_scales - 1) * rows_out * d_pad,
            transcendentals=0,
            bytes_accessed=(n_scales + 1) * rows_out * d_pad * itemsize,
        ),
    )(pe_stacked)

    # Lane-dense kernel output; only trim init-time padding when the caller's
    # shapes are not already (sublane, 128)-aligned (tiny XLA slice, done
    # outside the kernel; a no-op for aligned d_model / seq_len).
    if rows_out != seq_len or d_pad != d_model:
        out = out[:seq_len, :d_model]
    return out.reshape(1, seq_len, d_model)


def _reference(pe_tables, seq_len):
    return sum(pe[:, :seq_len, :] for pe in pe_tables)


if __name__ == "__main__":
    key = jax.random.PRNGKey(0)

    # --- main check: shapes consistent with the module's forward -------------
    #   batch=2, seq=8, d_model=32, max_len=64, scales=[1, 2, 4] (3 tables).
    k_x, k0, k1, k2 = jax.random.split(key, 4)
    batch, seq, d_model, max_len = 2, 8, 32, 64
    x = jax.random.normal(k_x, (batch, seq, d_model), dtype=jnp.float32)
    pe_tables = [
        jax.random.normal(k, (1, max_len, d_model), dtype=jnp.float32)
        for k in (k0, k1, k2)
    ]
    packed, L, D = prepare_pe_params(pe_tables)          # one-time, init
    out = multi_scale_positional_embedding(x, packed, L, D)
    out = jax.block_until_ready(out)
    assert out.shape == (1, seq, d_model)
    assert jnp.allclose(out, _reference(pe_tables, seq), atol=1e-6), \
        "mismatch vs reference (main)"

    # --- multi-tile pipelined, lane-dense path (D multiple of 128) -----------
    k_x2, k3, k4, k5 = jax.random.split(jax.random.PRNGKey(1), 4)
    seq2, d2, max2 = 100, 256, 512
    x2 = jax.random.normal(k_x2, (1, seq2, d2), dtype=jnp.float32)
    pes2 = [jax.random.normal(k, (1, max2, d2), dtype=jnp.float32)
            for k in (k3, k4, k5)]
    packed2, L2, D2 = prepare_pe_params(pes2)
    out2 = multi_scale_positional_embedding(
        x2, packed2, L2, D2,
        pipeline_vmem_budget_bytes=512 * 1024)  # force small tiles / grid > 1
    out2 = jax.block_until_ready(out2)
    assert jnp.allclose(out2, _reference(pes2, seq2), atol=1e-6), \
        "mismatch vs reference (tiled)"

    # --- non-aligned seq / d_model / max_len (padding path) ------------------
    k_x3, k6, k7, k8 = jax.random.split(jax.random.PRNGKey(2), 4)
    seq3, d3, max3 = 10, 48, 40
    x3 = jax.random.normal(k_x3, (2, seq3, d3), dtype=jnp.float32)
    pes3 = [jax.random.normal(k, (1, max3, d3), dtype=jnp.float32)
            for k in (k6, k7, k8)]
    packed3, L3, D3 = prepare_pe_params(pes3)
    out3 = jax.block_until_ready(
        multi_scale_positional_embedding(x3, packed3, L3, D3))
    assert out3.shape == (1, seq3, d3)
    assert jnp.allclose(out3, _reference(pes3, seq3), atol=1e-6), \
        "mismatch vs reference (padded)"

    # --- bf16 tables (sublane multiple 16) ------------------------------------
    k_x4, k9, k10, k11 = jax.random.split(jax.random.PRNGKey(3), 4)
    seq4, d4, max4 = 24, 128, 50
    x4 = jax.random.normal(k_x4, (1, seq4, d4), dtype=jnp.bfloat16)
    pes4 = [jax.random.normal(k, (1, max4, d4), dtype=jnp.bfloat16)
            for k in (k9, k10, k11)]
    packed4, L4, D4 = prepare_pe_params(pes4)
    out4 = jax.block_until_ready(
        multi_scale_positional_embedding(x4, packed4, L4, D4))
    assert jnp.allclose(out4.astype(jnp.float32),
                        _reference(pes4, seq4).astype(jnp.float32),
                        atol=1e-1), "mismatch vs reference (bf16)"

    print("KERNEL_OK")
</pallas_src>

<mosaic_0001>
module attributes {stable_mosaic.version = 11 : i64} {
  func.func @_pe_sum_kernel(%arg0: i32, %arg1: memref<3x8x128xf32, #tpu.memory_space<vmem>>, %arg2: memref<8x128xf32, #tpu.memory_space<vmem>>) attributes {dimension_semantics = [#tpu.dimension_semantics<parallel>], iteration_bounds = array<i64: 1>, scalar_prefetch = 0 : i64, scratch_operands = 0 : i64, tpu.core_type = #tpu.core_type<tc>, window_params = [{transform_indices = @transform_0, window_bounds = array<i64: 3, 8, 128>}, {transform_indices = @transform_1, window_bounds = array<i64: 8, 128>}]} {
    %c0 = arith.constant 0 : index
    %c0_0 = arith.constant 0 : index
    %c0_1 = arith.constant 0 : index
    %0 = vector.load %arg1[%c0, %c0_0, %c0_1] : memref<3x8x128xf32, #tpu.memory_space<vmem>>, vector<1x8x128xf32>
    %1 = vector.shape_cast %0 : vector<1x8x128xf32> to vector<8x128xf32>
    %c1 = arith.constant 1 : index
    %c0_2 = arith.constant 0 : index
    %c0_3 = arith.constant 0 : index
    %2 = vector.load %arg1[%c1, %c0_2, %c0_3] : memref<3x8x128xf32, #tpu.memory_space<vmem>>, vector<1x8x128xf32>
    %3 = vector.shape_cast %2 : vector<1x8x128xf32> to vector<8x128xf32>
    %4 = arith.addf %1, %3 : vector<8x128xf32>
    %c2 = arith.constant 2 : index
    %c0_4 = arith.constant 0 : index
    %c0_5 = arith.constant 0 : index
    %5 = vector.load %arg1[%c2, %c0_4, %c0_5] : memref<3x8x128xf32, #tpu.memory_space<vmem>>, vector<1x8x128xf32>
    %6 = vector.shape_cast %5 : vector<1x8x128xf32> to vector<8x128xf32>
    %7 = arith.addf %4, %6 : vector<8x128xf32>
    %c0_6 = arith.constant 0 : index
    %c0_7 = arith.constant 0 : index
    %8 = vector.load %arg2[%c0_6, %c0_7] : memref<8x128xf32, #tpu.memory_space<vmem>>, vector<8x128xf32>
    tpu.vector_store %arg2[%c0_6, %c0_7], %7 {strides = array<i32>} : memref<8x128xf32, #tpu.memory_space<vmem>>, vector<8x128xf32>,
    return
  }
  func.func @transform_0(%arg0: i32) -> (i32, i32, i32) {
    %c0_i32 = arith.constant 0 : i32
    %c0_i32_0 = arith.constant 0 : i32
    %c0_i32_1 = arith.constant 0 : i32
    return %c0_i32, %arg0, %c0_i32_0 : i32, i32, i32
  }
  func.func @transform_1(%arg0: i32) -> (i32, i32) {
    %c0_i32 = arith.constant 0 : i32
    %c0_i32_0 = arith.constant 0 : i32
    return %arg0, %c0_i32 : i32, i32
  }
}

</mosaic_0001>

<bundles_post_ra>
// kernel: tpu_custom_call.1
= control target key start
LH: loop header
LB: loop body
LE: loop exit
PB: predicated region body
PF: predicated region fallthrough
CT: control target
= control target key end

     0   :  { %6 = vsyncpa [#allocation3], 0  ;;  %s116_s0 = inlined_call_operand.hbm [shape: f32[3,64,128], index: 0, kind: input, shape index: {}]   ;;  %s117_s1 = inlined_call_operand.hbm [shape: f32[8,128], index: 1, kind: output, shape index: {}]  }
   0x1   :  { %7 = vsyncpa [#allocation4], 0  ;;  %s95_s6 = smov [#allocation2]  }
   0x2   :  { %s13_s7 = sshll.u32 %s95_s6, 4  ;;  %s14_s7 = int_to_ptr.vmem [resolvable:$true] %s13_s7 }
   0x3   :  { %s59_s8 = scalar_lea.vmem %s14_s7, 384  ;;  %p64_p1 = scmp.lt.s32.totalorder %s14_s7, %s14_s7 }
   0x4   :  { %p60_p0 = scmp.ne.s32.totalorder %s14_s7, %s59_s8  ;;  %p65_p2 = scmp.lt.s32.totalorder %s59_s8, %s59_s8 }
   0x6   :  { %p66_p3 = por %p65_p2, %p64_p1 }
   0x8   :  { %p67_p4 = pnand %p66_p3, %p60_p0 }
   0xa   :  { %70 = shalt.err (!%p67_p4)
}
   0xb   :  { %s96_s9 = smov 1024   ;;  %s97_s10 = smov 128  }
   0xc   :  { %s98_s11 = smov 8  }
   0xd   :  { %19 = dma.hbm_to_vmem [thread:$0]  %s116_s0, 384, %s14_s7, [#allocation3], %s96_s9, %s97_s10, %s98_s11  }
   0xe   :  { %91 = dma.done.wait [#allocation3], 384  }
   0xf   :  { %92 = vsyncadd [#allocation3], 4294966912  ;;  %v23_v0 = vld [vmem:[#allocation2] sm:$0xff]  ;;  %v25_v1 = vld [vmem:[#allocation2 + $0x8] sm:$0xff]  ;;  %s99_s14 = smov [#allocation5]  }
  0x10   :  { %v28_v2 = vld [vmem:[#allocation2 + $0x10] sm:$0xff]  ;;  %s37_s15 = sshll.u32 %s99_s14, 4  ;;  %v26_v3 = vadd.f32 %v25_v1, %v23_v0  ;;  %s38_s15 = int_to_ptr.vmem [resolvable:$true] %s37_s15 }
  0x11   :  { %s71_s16 = scalar_lea.vmem %s38_s15, 128  ;;  %p76_p6 = scmp.lt.s32.totalorder %s38_s15, %s38_s15 }
  0x12   :  { %v29_v4 = vadd.f32 %v28_v2, %v26_v3  ;;  %p72_p5 = scmp.ne.s32.totalorder %s38_s15, %s71_s16  ;;  %p77_p7 = scmp.lt.s32.totalorder %s71_s16, %s71_s16 }
  0x14   :  { %30 = vst [vmem:[#allocation5] sm:$0xff] %v29_v4  ;;  %p78_p8 = por %p77_p7, %p76_p6 }
  0x16   :  { %p79_p9 = pnand %p78_p8, %p72_p5 }
  0x18   :  { %82 = shalt.err (!%p79_p9)
}
  0x19   :  { %40 = dma.vmem_to_hbm [thread:$0]  %s38_s15, 128, %s117_s1, [#allocation4]  }
  0x1a   :  { %93 = dma.done.wait [#allocation4], 128  }
  0x1b   :  { %94 = vsyncadd [#allocation4], 4294967168 }
  0x1c   :  { %44 = vsyncpa [#allocation3], 1 }
  0x1d   :  { %45 = vsyncpa [#allocation4], 1 }

</bundles_post_ra>
